<compile_context>
chip_gen: v7x
topology: tpu7x:2x2x1
jax: 0.10.0
libtpu: 0.0.40
codegen_flags: <defaults>
</compile_context>

<pallas_src>
import jax
import jax.numpy as jnp
from jax.experimental import pallas as pl
from jax.experimental.pallas import tpu as pltpu


def conv1x1_relu_kernel(x_ref, w_ref, b_ref, o_ref):
    # x_ref: (b_tile, in_c, L)   w_ref: (out_c, in_c)   b_ref: (out_c, 1)
    # o_ref: (b_tile, out_c, L)
    w = w_ref[...]
    bias = b_ref[...]
    # Small static batch loop: each item is a plain (out_c,in_c)x(in_c,L)
    # matmul -> no batched-dot / transpose in the lowering.  Compute is not
    # the bottleneck here; the kernel is HBM-bandwidth bound.
    for bi in range(x_ref.shape[0]):
        y = jnp.dot(w, x_ref[bi], preferred_element_type=jnp.float32)
        o_ref[bi] = jnp.maximum(y + bias, 0.0).astype(o_ref.dtype)


def channel_recombination(x, weight, bias):
    """1x1 conv + ReLU on NCHW input.

    x:      (b, in_c, h, w) float32
    weight: (out_c, in_c, 1, 1) or (out_c, in_c)
    bias:   (out_c,)
    returns (b, out_c, h, w)
    """
    b, in_c, h, w = x.shape
    w2d = weight.reshape(weight.shape[0], in_c)
    out_c = w2d.shape[0]
    bias2d = bias.reshape(out_c, 1)

    hw = h * w
    x_flat = x.reshape(b, in_c, hw)            # layout-preserving, free

    lane = 128
    # VMEM budget for the double-buffered streaming blocks (in + out), f32.
    # 8 MiB is comfortably under every generation's scoped-VMEM default
    # (v5e 16 MiB, v6e/v7x 32 MiB), leaving pipelining headroom.
    vmem_budget = 8 * 1024 * 1024
    bytes_per_lane_per_item = 2 * (in_c + out_c) * 4   # double-buffered, f32

    # Whole batch per step when it fits (it always does for MATL-like configs);
    # otherwise tile the batch too.
    b_tile = max(1, min(b, vmem_budget // (bytes_per_lane_per_item * lane)))
    max_lanes = vmem_budget // (bytes_per_lane_per_item * b_tile)
    max_lanes = min(64 * 1024, max(lane, (max_lanes // lane) * lane))

    # Lane (spatial) tiling:
    #  - tiny spatial extent: one full-dim block (exempt from the 128 rule)
    #  - fits in budget:      split into 2 lane-aligned tiles (v7x: 2 TCs busy)
    #  - larger than budget:  stream in max-size lane-aligned tiles
    if hw < 2 * lane:
        hw_tile = hw
    elif hw <= max_lanes:
        hw_tile = pl.cdiv(pl.cdiv(hw, 2), lane) * lane
    else:
        hw_tile = max_lanes
    n_hw = pl.cdiv(hw, hw_tile)
    n_b = pl.cdiv(b, b_tile)

    grid = (n_b, n_hw)

    # Memory-bound custom call: advisory cost so XLA overlaps neighbors.
    cost = pl.CostEstimate(
        flops=2 * b * out_c * in_c * hw,
        transcendentals=0,
        bytes_accessed=(b * (in_c + out_c) * hw + out_c * in_c + out_c) * 4,
    )

    out_flat = pl.pallas_call(
        conv1x1_relu_kernel,
        out_shape=jax.ShapeDtypeStruct((b, out_c, hw), x.dtype),
        grid=grid,
        in_specs=[
            pl.BlockSpec((b_tile, in_c, hw_tile), lambda i, j: (i, 0, j)),
            pl.BlockSpec((out_c, in_c), lambda i, j: (0, 0)),   # VMEM-resident
            pl.BlockSpec((out_c, 1), lambda i, j: (0, 0)),      # VMEM-resident
        ],
        out_specs=pl.BlockSpec((b_tile, out_c, hw_tile), lambda i, j: (i, 0, j)),
        compiler_params=pltpu.CompilerParams(
            dimension_semantics=("parallel", "parallel"),
        ),
        cost_estimate=cost,
    )(x_flat, w2d, bias2d)

    return out_flat.reshape(b, out_c, h, w)


def reference(x, weight, bias):
    w2d = weight.reshape(weight.shape[0], x.shape[1])
    y = jnp.einsum('oi,bihw->bohw', w2d, x) + bias.reshape(1, -1, 1, 1)
    return jnp.maximum(y, 0.0)


if __name__ == "__main__":
    # Module config: in_channels=4, out_channels=8, batch=2, spatial=16.
    batch, in_channels, out_channels, spatial = 2, 4, 8, 16

    key = jax.random.PRNGKey(0)
    kx, kw, kb = jax.random.split(key, 3)

    x = jax.random.normal(
        kx, (batch, in_channels, spatial, spatial), dtype=jnp.float32)
    # Conv2d weight layout as in PyTorch: (out_c, in_c, 1, 1)
    weight = jax.random.normal(
        kw, (out_channels, in_channels, 1, 1), dtype=jnp.float32) * 0.1
    bias = jax.random.normal(kb, (out_channels,), dtype=jnp.float32) * 0.1

    out = channel_recombination(x, weight, bias)
    out = jax.block_until_ready(out)

    ref = reference(x, weight, bias)
    assert out.shape == (batch, out_channels, spatial, spatial)
    assert jnp.allclose(out, ref, atol=1e-5, rtol=1e-5), "mismatch vs reference"

    print("KERNEL_OK")
</pallas_src>

<mosaic_0001>
module attributes {stable_mosaic.version = 11 : i64} {
  func.func @conv1x1_relu_kernel(%arg0: i32, %arg1: i32, %arg2: memref<2x4x128xf32, #tpu.memory_space<vmem>>, %arg3: memref<8x4xf32, #tpu.memory_space<vmem>>, %arg4: memref<8x1xf32, #tpu.memory_space<vmem>>, %arg5: memref<2x8x128xf32, #tpu.memory_space<vmem>>) attributes {dimension_semantics = [#tpu.dimension_semantics<parallel>, #tpu.dimension_semantics<parallel>], iteration_bounds = array<i64: 1, 2>, scalar_prefetch = 0 : i64, scratch_operands = 0 : i64, tpu.core_type = #tpu.core_type<tc>, window_params = [{transform_indices = @transform_0, window_bounds = array<i64: 2, 4, 128>}, {pipeline_mode = #tpu.pipeline_mode<synchronous>, transform_indices = @transform_1, window_bounds = array<i64: 8, 4>}, {pipeline_mode = #tpu.pipeline_mode<synchronous>, transform_indices = @transform_2, window_bounds = array<i64: 8, 1>}, {transform_indices = @transform_3, window_bounds = array<i64: 2, 8, 128>}]} {
    %c0 = arith.constant 0 : index
    %c0_0 = arith.constant 0 : index
    %0 = vector.load %arg3[%c0, %c0_0] : memref<8x4xf32, #tpu.memory_space<vmem>>, vector<8x4xf32>
    %c0_1 = arith.constant 0 : index
    %c0_2 = arith.constant 0 : index
    %1 = vector.load %arg4[%c0_1, %c0_2] : memref<8x1xf32, #tpu.memory_space<vmem>>, vector<8x1xf32>
    %c0_3 = arith.constant 0 : index
    %c0_4 = arith.constant 0 : index
    %c0_5 = arith.constant 0 : index
    %2 = vector.load %arg2[%c0_3, %c0_4, %c0_5] : memref<2x4x128xf32, #tpu.memory_space<vmem>>, vector<1x4x128xf32>
    %3 = vector.shape_cast %2 : vector<1x4x128xf32> to vector<4x128xf32>
    %cst = arith.constant dense<0.000000e+00> : vector<8x128xf32>
    %4 = tpu.matmul %0, %3, %cst {dimension_numbers = #tpu.dot_dimension_numbers<[1], [0], [0], [1], [0, 0, 1, 1], [], []>} : vector<8x4xf32>, vector<4x128xf32>, vector<8x128xf32> -> vector<8x128xf32>
    %5 = vector.broadcast %1 : vector<8x1xf32> to vector<8x128xf32>
    %6 = arith.addf %4, %5 : vector<8x128xf32>
    %cst_6 = arith.constant 0.000000e+00 : f32
    %7 = vector.broadcast %cst_6 : f32 to vector<8x128xf32>
    %8 = arith.maximumf %6, %7 : vector<8x128xf32>
    %c0_7 = arith.constant 0 : index
    %c0_8 = arith.constant 0 : index
    %c0_9 = arith.constant 0 : index
    %9 = vector.load %arg5[%c0_7, %c0_8, %c0_9] : memref<2x8x128xf32, #tpu.memory_space<vmem>>, vector<1x8x128xf32>
    %10 = vector.shape_cast %9 : vector<1x8x128xf32> to vector<8x128xf32>
    %11 = vector.shape_cast %8 : vector<8x128xf32> to vector<1x8x128xf32>
    tpu.vector_store %arg5[%c0_7, %c0_8, %c0_9], %11 {strides = array<i32>} : memref<2x8x128xf32, #tpu.memory_space<vmem>>, vector<1x8x128xf32>,
    %c1 = arith.constant 1 : index
    %c0_10 = arith.constant 0 : index
    %c0_11 = arith.constant 0 : index
    %12 = vector.load %arg2[%c1, %c0_10, %c0_11] : memref<2x4x128xf32, #tpu.memory_space<vmem>>, vector<1x4x128xf32>
    %13 = vector.shape_cast %12 : vector<1x4x128xf32> to vector<4x128xf32>
    %cst_12 = arith.constant dense<0.000000e+00> : vector<8x128xf32>
    %14 = tpu.matmul %0, %13, %cst_12 {dimension_numbers = #tpu.dot_dimension_numbers<[1], [0], [0], [1], [0, 0, 1, 1], [], []>} : vector<8x4xf32>, vector<4x128xf32>, vector<8x128xf32> -> vector<8x128xf32>
    %15 = vector.broadcast %1 : vector<8x1xf32> to vector<8x128xf32>
    %16 = arith.addf %14, %15 : vector<8x128xf32>
    %cst_13 = arith.constant 0.000000e+00 : f32
    %17 = vector.broadcast %cst_13 : f32 to vector<8x128xf32>
    %18 = arith.maximumf %16, %17 : vector<8x128xf32>
    %c1_14 = arith.constant 1 : index
    %c0_15 = arith.constant 0 : index
    %c0_16 = arith.constant 0 : index
    %19 = vector.load %arg5[%c1_14, %c0_15, %c0_16] : memref<2x8x128xf32, #tpu.memory_space<vmem>>, vector<1x8x128xf32>
    %20 = vector.shape_cast %19 : vector<1x8x128xf32> to vector<8x128xf32>
    %21 = vector.shape_cast %18 : vector<8x128xf32> to vector<1x8x128xf32>
    tpu.vector_store %arg5[%c1_14, %c0_15, %c0_16], %21 {strides = array<i32>} : memref<2x8x128xf32, #tpu.memory_space<vmem>>, vector<1x8x128xf32>,
    return
  }
  func.func @transform_0(%arg0: i32, %arg1: i32) -> (i32, i32, i32) {
    %c0_i32 = arith.constant 0 : i32
    %c0_i32_0 = arith.constant 0 : i32
    return %arg0, %c0_i32, %arg1 : i32, i32, i32
  }
  func.func @transform_1(%arg0: i32, %arg1: i32) -> (i32, i32) {
    %c0_i32 = arith.constant 0 : i32
    %c0_i32_0 = arith.constant 0 : i32
    %c0_i32_1 = arith.constant 0 : i32
    return %c0_i32, %c0_i32_0 : i32, i32
  }
  func.func @transform_2(%arg0: i32, %arg1: i32) -> (i32, i32) {
    %c0_i32 = arith.constant 0 : i32
    %c0_i32_0 = arith.constant 0 : i32
    %c0_i32_1 = arith.constant 0 : i32
    return %c0_i32, %c0_i32_0 : i32, i32
  }
  func.func @transform_3(%arg0: i32, %arg1: i32) -> (i32, i32, i32) {
    %c0_i32 = arith.constant 0 : i32
    %c0_i32_0 = arith.constant 0 : i32
    return %arg0, %c0_i32, %arg1 : i32, i32, i32
  }
}

</mosaic_0001>

<bundles_post_ra>
// kernel: tpu_custom_call.1
= control target key start
LH: loop header
LB: loop body
LE: loop exit
PB: predicated region body
PF: predicated region fallthrough
CT: control target
= control target key end

     0   :  { %8 = vsyncpa [#allocation4], 0  ;;  %s829_s0 = inlined_call_operand.vmem [shape: f32[2,4,256], index: 0, kind: input, shape index: {}]   ;;  %s830_s1 = inlined_call_operand.vmem [shape: f32[8,4], index: 1, kind: input, shape index: {}]   ;;  %s831_s2 = inlined_call_operand.vmem [shape: f32[8,1], index: 2, kind: input, shape index: {}]   ;;  %s832_s3 = inlined_call_operand.hbm [shape: f32[2,8,256], index: 3, kind: output, shape index: {}]  }
   0x1   :  { %10 = vsyncpa [#allocation4 + $0x1], 0  ;;  %s699_s12 = smov 0   ;;  %s701_s13 = smov 0  }
   0x2   :  { %s703_s14 = smov 0   ;;  %s705_s15 = smov 0  }
   0x3   :  { %s707_s16 = smov 0   ;;  %s709_s17 = smov 0  }
   0x4 LB: > { %s497_s18 = sadd.s32 4294967295, %s670_s17   ;;  %s498_s19 = sadd.s32 4294967294, %s670_s17   ;;  %s670_s17 = sphi %s709_s17, %s16_s17   ;;  %s666_s16 = sphi %s707_s16, %s839_s16   ;;  %s662_s15 = sphi %s705_s15, %s838_s15   ;;  %s658_s14 = sphi %s703_s14, %s837_s14   ;;  %s654_s13 = sphi %s701_s13, %s836_s13   ;;  %s650_s12 = sphi %s699_s12, %s835_s12  }
   0x5   : > { %s25_s20 = sadd.s32 1, %s666_s16  ;;  %s37_s21 = sadd.s32 1, %s658_s14 }
   0x6   : > { %p26_p0 = scmp.ge.s32.totalorder %s25_s20, 2  ;;  %p44_p1 = scmp.ne.s32.totalorder %s658_s14, %s654_s13 }
   0x7   : > { %p45_p2 = scmp.eq.s32.totalorder %s670_s17, 0  ;;  %p118_p3 = scmp.eq.s32.totalorder %s497_s18, 1 }
   0x8   : > { %s841_s20 = smov (%p26_p0, %s25_s20), 0  ;;  %p123_p6 = scmp.ne.s32.totalorder %s654_s13, %s650_s12 }
   0x9   : > { %p46_p4 = por %p45_p2, %p44_p1  ;;  %p738_p5 = por %p118_p3, %p44_p1 }
   0xa   : > { %s33_s23 = ssub.s32 %s666_s16, %s841_s20  ;;  %p124_p8 = scmp.eq.s32.totalorder %s498_s19, 1 }
   0xb   : > { %p35_p7 = scmp.eq.s32.totalorder %s33_s23, 0  ;;  %p500_p10 = scmp.ge.s32.totalorder %s670_s17, 2 }
   0xc   : > { %p749_p9 = por %p124_p8, %p123_p6 }
   0xd   : > { %s747_s24 = scalar_select %p35_p7, %s658_s14, %s37_s21  }
   0xe   : > { %146 = sbr.rel (%p500_p10) target bundleno = 28 (0x1c), region = 24 }
  0x15   : > { %149 = sbr.rel (!%p46_p4) target bundleno = 28 (0x1c), region = 28  ;;  %s151_s26 = sand.u32 (%p46_p4), 1, %s658_s14  }
  0x16   : > { %s502_s27 = sshll.u32 (%p46_p4), %s666_s16, 2  ;;  %s501_s28 = sshll.u32 (%p46_p4), %s151_s26, 3 }
  0x17   : > { %s158_s4 = scalar_lea.vmem (%p46_p4), %s829_s0, %s502_s27  ;;  %s153_s5 = scalar_lea.vmem (%p46_p4), [#allocation2], %s501_s28 }
  0x18   : > { %v174_v0 = vld [vmem:[%s158_s4] sm:$0xf] (%p46_p4)  ;;  %v176_v1 = vld [vmem:[%s158_s4 + $0x8] sm:$0xf] (%p46_p4) }
  0x19   : > { %175 = vst [vmem:[%s153_s5] sm:$0xf] (%p46_p4), %v174_v0  ;;  %177 = vst [vmem:[%s153_s5 + $0x4] sm:$0xf] (%p46_p4), %v176_v1 }
  0x1c PF: > { %p503_p11 = scmp.ge.s32.totalorder %s670_s17, 1  ;;  %p203_p12 = scmp.lt.s32.totalorder %s670_s17, 3 }
  0x1e   : > { %p204_p13 = pnand %p503_p11, %p203_p12 }
  0x1f   : > { %s764_s6 = sand.u32 (!%p204_p13), 1, %s654_s13   ;;  %v672_v2 = vmov (!%p204_p13), 0.0   ;;  %vm247_vm0 = vcmask (!%p204_p13), 1043456   ;;  %vm673_vm1 = vmmov (!%p204_p13), 0   ;;  %v235_v3 = vld [vmem:[%s830_s1] sm:$0xff] (!%p204_p13)  ;;  %vm243_vm2 = vcmask (!%p204_p13), 31744  }
  0x20   : > { %207 = sbr.rel (%p204_p13) target bundleno = 268 (0x10c), region = 69  ;;  %520 = vmatprep.subr.mxu0 (!%p204_p13), %v672_v2  ;;  %525 = vmatprep.subr.mxu1 (!%p204_p13), %v672_v2  ;;  %s504_s7 = sshll.u32 (!%p204_p13), %s764_s6, 3  ;;  %v674_v6 = vmov (!%p204_p13), 0   ;;  %v236_v7 = vld [vmem:[%s831_s2] sm:$0xff] (!%p204_p13) }
  0x21   : > { %522 = vmatprep.mubr.msk.f32.mxu0 (!%p204_p13), %vm673_vm1, %v672_v2  ;;  %527 = vmatprep.mubr.msk.f32.mxu1 (!%p204_p13), %vm673_vm1, %v672_v2  ;;  %s212_s10 = scalar_lea.vmem (!%p204_p13), [#allocation2], %s504_s7  ;;  %s505_s19 = sshll.u32 (!%p204_p13), %s764_s6, 4 }
  0x22   : > { %v237_v4 = vld [vmem:[%s212_s10] sm:$0xf] (!%p204_p13)  ;;  %v508_v5 = vld [vmem:[%s212_s10 + $0x4] sm:$0xf] (!%p204_p13)  ;;  %591 = vset.pattern.permute.xlu0 (!%p204_p13), %v674_v6  ;;  %s232_s21 = scalar_lea.vmem (!%p204_p13), [#allocation3], %s505_s19  ;;  %s513_s26 = sshll.u32 (!%p204_p13), %s662_s15, 7 }
  0x23   : > { %521 = vmatpush3.msk.msra.mxu0 (!%p204_p13), %vm247_vm0, %v237_v4  ;;  %526 = vmatpush3.msk.msra.mxu1 (!%p204_p13), %vm247_vm0, %v508_v5  ;;  %s417_s23 = sshll.u32 (!%p204_p13), %s232_s21, 4  ;;  %s780_s29 = scalar_lea.hbm (!%p204_p13), %s832_s3, %s513_s26  ;;  %s775_s23 = int_to_ptr.vmem [resolvable:$true] %s417_s23 }
  0x24   : > { %523 = vmatmul.mubr.msk.f32.vlgmr.msra.gmra.mrb[0].mxu0 (!%p204_p13), %vm243_vm2, %v235_v3  ;;  %528 = vmatmul.mubr.msk.f32.vlgmr.msra.gmra.mrb[0].mxu1 (!%p204_p13), %vm243_vm2, %v235_v3  ;;  %s402_s15 = scalar_lea.sflag (!%p204_p13), [#allocation4], %s764_s6  ;;  %s592_s30 = scalar_lea.vmem (!%p204_p13), %s775_s23, 256 }
  0x25   : > { %240 = vperm.xlu0 (!%p204_p13), %591, %v236_v7   ;;  %p593_p0 = scmp.ne.s32.totalorder (!%p204_p13), %s775_s23, %s592_s30  ;;  %s675_s4 = smov (!%p204_p13), [#allocation3]  }
  0x26   : > { %s596_s5 = sshll.u32 (!%p204_p13), %s675_s4, 4  ;;  %s597_s5 = int_to_ptr.vmem [resolvable:$false] %s596_s5 }
  0x27   : > { %p594_p1 = pnand %p593_p0, %p738_p5  ;;  %s598_s7 = scalar_lea.vmem %s597_s5, 512 }
  0x28   : > { %p599_p3 = scmp.lt.s32.totalorder %s775_s23, %s597_s5  ;;  %p600_p4 = scmp.lt.s32.totalorder %s598_s7, %s592_s30 }
  0x29   : > { %p595_p2 = pneg %p594_p1 }
  0x2a   : > { %p601_p6 = por %p600_p4, %p599_p3 }
  0x2c   : > { %p602_p7 = pnand %p601_p6, %p595_p2 }
  0xa4   : > { %v241_v8 = vpop.permute.xlu0 %240 }
  0xf7   : > { %v317_v9 = vpop.f32.mrb[0].mxu0  ;;  %v394_v10 = vpop.f32.mrb[0].mxu1 }
  0xf8   : > { %v318_v11 = vadd.f32 %v317_v9, %v241_v8  ;;  %v395_v12 = vadd.f32 %v394_v10, %v241_v8  ;;  %v524_v13 = vpop.f32.mrb[1].mxu0  ;;  %v529_v14 = vpop.f32.mrb[1].mxu1 }
  0xfa   : > { %v321_v15 = vmax.f32 %v318_v11, 0.0  ;;  %v398_v16 = vmax.f32 %v395_v12, 0.0 }
  0xfc   : > { %322 = vst [vmem:[%s232_s21] sm:$0xff] %v321_v15  ;;  %511 = vst [vmem:[%s232_s21 + $0x8] sm:$0xff] %v398_v16 }
  0xfd   : > { %605 = shalt.err (!%p602_p7)
}
  0xfe   : > { %s606_s8 = scalar_lea.hbm %s780_s29, 256  ;;  %s610_s11 = scalar_lea.hbm %s832_s3, 512 }
  0xff   : > { %p607_p8 = scmp.ne.s32.totalorder %s780_s29, %s606_s8  ;;  %p611_p13 = scmp.lt.u32.totalorder %s780_s29, %s832_s3 }
 0x100   : > { %p612_p0 = scmp.lt.u32.totalorder %s610_s11, %s606_s8  ;;  %p614_p2 = scmp.lt.u32.totalorder %s606_s8, %s780_s29 }
 0x101   : > { %p608_p11 = pnand %p607_p8, %p738_p5 }
 0x102   : > { %p613_p1 = por %p612_p0, %p611_p13 }
 0x103   : > { %p609_p12 = pneg %p608_p11 }
 0x104   : > { %p615_p3 = por %p614_p2, %p613_p1 }
 0x106   : > { %p616_p4 = pnand %p615_p3, %p609_p12 }
 0x108   : > { %619 = shalt.err (!%p616_p4)
}
 0x109   : > { %s676_s21 = smov 128   ;;  %s677_s26 = smov 256  }
 0x10a   : > { %s678_s27 = smov 8  }
 0x10b   : > { %530 = dma.vmem_to_hbm [thread:$0]  (%p738_p5), %s775_s23, 256, %s780_s29, %s402_s15, %s676_s21, %s677_s26, %s678_s27  }
 0x10c PF: > { %s432_s28 = sand.u32 1, %s650_s12   ;;  %p533_p6 = pnand %p500_p10, %p749_p9 }
 0x10d   : > { %s433_s30 = scalar_lea.sflag [#allocation4], %s432_s28 }
 0x10e   : > { %645 = dma.done.wait (!%p533_p6), %s433_s30, 256  }
 0x10f   : > { %647 = vsyncadd (!%p533_p6), %s433_s30, 4294967040  ;;  %s16_s17 = sadd.s32 1, %s670_s17   ;;  %s835_s12 = smov %s654_s13 }
 0x110   : > { %p13_p7 = scmp.ge.s32.totalorder %s16_s17, 4   ;;  %s836_s13 = smov %s658_s14 }
 0x111   : > { %s837_s14 = smov %s747_s24  ;;  %s838_s15 = smov %s666_s16 }
 0x112   : > { %s839_s16 = smov %s841_s20  ;;  %15 = sbr.rel (!%p13_p7) target bundleno = 4 (0x4), region = 115 }
 0x119   :  { %438 = vsyncpa [#allocation4], 1 }
 0x11a   :  { %440 = vsyncpa [#allocation4 + $0x1], 1 }

</bundles_post_ra>
